<compile_context>
chip_gen: v7x
topology: tpu7x:2x2x1
jax: 0.10.0
libtpu: 0.0.40
codegen_flags: <defaults>
</compile_context>

<pallas_src>
import functools

import jax
import jax.numpy as jnp
from jax.experimental import pallas as pl
from jax.experimental.pallas import tpu as pltpu

_LANE = 128            # vreg lane width
_SUBLANE_PACK = 32     # covers f32 (8), bf16 (16), int8/fp8 (32) sublane tiles
_SPLIT_MIN_ROWS = 2048 # ~1 MiB f32: worth splitting across the 2 v7x TCs


def _round_up(n, m):
    return ((n + m - 1) // m) * m


def _lambda_func(x):
    # The concrete `func` wrapped by Lambda in the ArcFace data pipeline.
    return (x - 0.5) * 2.0


def _lambda_kernel(x_ref, o_ref):
    # Pure VPU elementwise work on a lane-dense [brows, 128] tile.
    # Compute in f32 so integer / low-precision inputs keep (x - 0.5) exact,
    # then cast to the output dtype.
    x = x_ref[...].astype(jnp.float32)
    o_ref[...] = _lambda_func(x).astype(o_ref.dtype)


@functools.lru_cache(maxsize=None)
def _streaming_config(max_itemsize):
    """Generation-aware (block_rows, vmem_limit_bytes)."""
    try:
        vmem_bytes = int(pltpu.get_tpu_info().vmem_capacity_bytes)
    except Exception:  # unknown backend / interpret mode: be conservative
        vmem_bytes = 64 * 1024 * 1024
    if vmem_bytes >= 100 * 1024 * 1024:
        # v5e / v6e: 128 MiB physical VMEM -> 8 MiB blocks, 64 MiB scoped.
        block_bytes, vmem_limit = 8 * 1024 * 1024, 64 * 1024 * 1024
    else:
        # v7x: 64 MiB physical VMEM shared by 2 TCs -> 4 MiB blocks, 32 MiB.
        block_bytes, vmem_limit = 4 * 1024 * 1024, 32 * 1024 * 1024
    block_rows = max(
        _SUBLANE_PACK,
        (block_bytes // (_LANE * max_itemsize)) // _SUBLANE_PACK * _SUBLANE_PACK,
    )
    return block_rows, vmem_limit


@functools.partial(jax.jit, static_argnames=("block_rows", "vmem_limit_bytes"))
def _lambda_forward_impl(x, *, block_rows, vmem_limit_bytes):
    orig_shape = x.shape
    total = x.size
    # PyTorch type promotion: (int_tensor - 0.5) * 2.0 yields a float tensor.
    out_dtype = x.dtype if jnp.issubdtype(x.dtype, jnp.floating) else jnp.float32

    if total == 0 or total % _LANE != 0:
        # Ragged tail (< 1 lane): a padded Pallas path would cost pad + slice,
        # i.e. 2 extra full HBM passes.  A single fused XLA elementwise pass
        # is strictly faster, so fall back for this (rare) case.
        # TODO(synk): masked-tail Pallas path if ragged shapes ever dominate.
        return _lambda_func(x.astype(jnp.float32)).astype(out_dtype)

    rows = total // _LANE
    slab = x.reshape(rows, _LANE)  # zero-copy lane-dense view

    brows = min(block_rows, _round_up(rows, _SUBLANE_PACK))
    # Ensure >= 2 grid steps for mid-size slabs so the "parallel" grid axis
    # can shard across both v7x TensorCores (negligible cost on v5e/v6e).
    if rows >= _SPLIT_MIN_ROWS and pl.cdiv(rows, brows) < 2:
        brows = _round_up(pl.cdiv(rows, 2), _SUBLANE_PACK)
    grid = pl.cdiv(rows, brows)  # ragged last block handled by Pallas masking

    cost = pl.CostEstimate(
        flops=2 * total,  # one sub + one mul per element
        transcendentals=0,
        bytes_accessed=total * (x.dtype.itemsize + jnp.dtype(out_dtype).itemsize),
    )

    out_slab = pl.pallas_call(
        _lambda_kernel,
        out_shape=jax.ShapeDtypeStruct((rows, _LANE), out_dtype),
        grid_spec=pltpu.PrefetchScalarGridSpec(
            num_scalar_prefetch=0,
            grid=(grid,),
            in_specs=[pl.BlockSpec((brows, _LANE), lambda i: (i, 0))],
            out_specs=pl.BlockSpec((brows, _LANE), lambda i: (i, 0)),
        ),
        compiler_params=pltpu.CompilerParams(
            dimension_semantics=("parallel",),
            vmem_limit_bytes=vmem_limit_bytes,
        ),
        cost_estimate=cost,
        # NOTE: no input_output_aliases -- the input is not donated at the jit
        # boundary, so aliasing would force a defensive full-tensor copy.
    )(slab)

    return out_slab.reshape(orig_shape)


def lambda_forward(x):
    """Apply Lambda(func) with func(x) = (x - 0.5) * 2.0, elementwise."""
    in_itemsize = int(jnp.dtype(x.dtype).itemsize)
    out_itemsize = in_itemsize if jnp.issubdtype(x.dtype, jnp.floating) else 4
    block_rows, vmem_limit = _streaming_config(max(in_itemsize, out_itemsize))
    return _lambda_forward_impl(
        x, block_rows=block_rows, vmem_limit_bytes=vmem_limit
    )


if __name__ == "__main__":
    key = jax.random.PRNGKey(0)
    # NCHW image batch, consistent with PyTorch conv/image conventions.
    x = jax.random.uniform(key, (2, 4, 16, 16), dtype=jnp.float32)

    out = jax.block_until_ready(lambda_forward(x))

    # Reference check of the Lambda semantics.
    ref = (x - 0.5) * 2.0
    assert out.shape == x.shape and out.dtype == x.dtype
    assert jnp.allclose(out, ref, atol=1e-6)

    # Integer input: PyTorch-style promotion to a float result.
    xi = (jax.random.uniform(key, (2, 4, 16, 16)) * 255.0).astype(jnp.uint8)
    outi = jax.block_until_ready(lambda_forward(xi))
    assert outi.dtype == jnp.float32
    assert jnp.allclose(outi, (xi.astype(jnp.float32) - 0.5) * 2.0, atol=1e-5)

    print("KERNEL_OK")
</pallas_src>

<mosaic_0001>
module attributes {stable_mosaic.version = 11 : i64} {
  func.func @_lambda_kernel(%arg0: i32, %arg1: memref<32x128xf32, #tpu.memory_space<vmem>>, %arg2: memref<32x128xf32, #tpu.memory_space<vmem>>) attributes {dimension_semantics = [#tpu.dimension_semantics<parallel>], iteration_bounds = array<i64: 1>, scalar_prefetch = 0 : i64, scratch_operands = 0 : i64, tpu.core_type = #tpu.core_type<tc>, window_params = [{transform_indices = @transform_0, window_bounds = array<i64: 32, 128>}, {transform_indices = @transform_1, window_bounds = array<i64: 32, 128>}]} {
    %c0 = arith.constant 0 : index
    %c0_0 = arith.constant 0 : index
    %0 = vector.load %arg1[%c0, %c0_0] : memref<32x128xf32, #tpu.memory_space<vmem>>, vector<32x128xf32>
    %cst = arith.constant 5.000000e-01 : f32
    %1 = vector.broadcast %cst : f32 to vector<32x128xf32>
    %2 = arith.subf %0, %1 : vector<32x128xf32>
    %cst_1 = arith.constant 2.000000e+00 : f32
    %3 = vector.broadcast %cst_1 : f32 to vector<32x128xf32>
    %4 = arith.mulf %2, %3 : vector<32x128xf32>
    %c0_2 = arith.constant 0 : index
    %c0_3 = arith.constant 0 : index
    %5 = vector.load %arg2[%c0_2, %c0_3] : memref<32x128xf32, #tpu.memory_space<vmem>>, vector<32x128xf32>
    tpu.vector_store %arg2[%c0_2, %c0_3], %4 {strides = array<i32>} : memref<32x128xf32, #tpu.memory_space<vmem>>, vector<32x128xf32>,
    return
  }
  func.func @transform_0(%arg0: i32) -> (i32, i32) {
    %c0_i32 = arith.constant 0 : i32
    %c0_i32_0 = arith.constant 0 : i32
    return %arg0, %c0_i32 : i32, i32
  }
  func.func @transform_1(%arg0: i32) -> (i32, i32) {
    %c0_i32 = arith.constant 0 : i32
    %c0_i32_0 = arith.constant 0 : i32
    return %arg0, %c0_i32 : i32, i32
  }
}

</mosaic_0001>

<bundles_post_ra>
// kernel: _lambda_forward_impl.1
= control target key start
LH: loop header
LB: loop body
LE: loop exit
PB: predicated region body
PF: predicated region fallthrough
CT: control target
= control target key end

     0   :  { %s94_s0 = inlined_call_operand.vmem [shape: f32[16,128], index: 0, kind: input, shape index: {}]   ;;  %s95_s1 = inlined_call_operand.vmem [shape: f32[16,128], index: 1, kind: output, shape index: {}]  }
   0x1   :  { %v8_v0 = vld [vmem:[%s94_s0] sm:$0xff]  ;;  %v9_v1 = vld [vmem:[%s94_s0 + $0x8] sm:$0xff] }
   0x2   :  { %v68_v2 = vadd.f32 -0.5, %v8_v0  ;;  %v69_v3 = vadd.f32 -0.5, %v9_v1 }
   0x4   :  { %v16_v4 = vmul.f32 2.0, %v68_v2  ;;  %v17_v5 = vmul.f32 2.0, %v69_v3 }
   0x6   :  { %56 = vst [vmem:[%s95_s1] sm:$0xff] %v16_v4  ;;  %58 = vst [vmem:[%s95_s1 + $0x8] sm:$0xff] %v17_v5 }

</bundles_post_ra>
